<compile_context>
chip_gen: v7x
topology: tpu7x:2x2x1
jax: 0.10.0
libtpu: 0.0.40
codegen_flags: <defaults>
</compile_context>

<pallas_src>
import functools

import jax
import jax.numpy as jnp
from jax import lax
from jax.experimental import pallas as pl
from jax.experimental.pallas import tpu as pltpu


_VMEM_LIMIT_BYTES = 32 * 1024 * 1024   # fits the v7x 64 MiB physical VMEM with headroom
_MXU_MIN_D = 32                        # below this, MXU contraction depth is wasted


# ----------------------------------------------------------------------------- helpers


def _round_up(x, m):
    return ((x + m - 1) // m) * m


def _choose_tile(n):
    # small problems: one 128-lane-dense tile; larger: 256x256 tiles (good HBM roofline)
    return 128 if n <= 128 else 256


def _pad_rows(x, n_pad):
    n = x.shape[0]
    if n == n_pad:
        return x
    return jnp.pad(x, ((0, n_pad - n), (0, 0)))


# ----------------------------------------------------------------------------- kernels


def _rbf_cov_kernel(params_ref, x1_ref, x2t_ref, o_ref, *, add_noise, use_mxu):
    """One (tile_m, tile_n) tile of the RBF covariance between x1 and x2.

    params_ref (SMEM, f32[3]): [0.5 / lengthscale^2, outputscale, noise_var]
    x1_ref : (tile_m, D)  block of X1
    x2t_ref: (D, tile_n)  block of X2^T
    """
    inv_two_l2 = params_ref[0]
    outputscale = params_ref[1]

    x1 = x1_ref[...].astype(jnp.float32)      # (tm, D)
    x2t = x2t_ref[...].astype(jnp.float32)    # (D, tn)
    tm = x1.shape[0]
    tn = x2t.shape[1]
    d = x1.shape[1]

    if use_mxu:
        # Gram trick on the MXU (worth it only for large D).
        x1_sq = jnp.sum(x1 * x1, axis=1, keepdims=True)        # (tm, 1)
        x2_sq = jnp.sum(x2t * x2t, axis=0, keepdims=True)      # (1, tn)
        cross = jnp.dot(x1, x2t, preferred_element_type=jnp.float32)
        sqdist = jnp.maximum(x1_sq + x2_sq - 2.0 * cross, 0.0)
    else:
        # Direct-difference on the VPU: exact non-negative, no cancellation, no MXU.
        sqdist = jnp.zeros((tm, tn), jnp.float32)
        for dd in range(d):                                    # static unroll (small D)
            diff = x1[:, dd:dd + 1] - x2t[dd:dd + 1, :]        # (tm,1)-(1,tn) -> (tm,tn)
            sqdist = sqdist + diff * diff

    k = outputscale * jnp.exp(-sqdist * inv_two_l2)
    o_ref[...] = k

    if add_noise:
        noise_var = params_ref[2]

        # Square tiles + self-covariance => global diagonal lives only on tiles i == j,
        # where it coincides with the local diagonal.
        @pl.when(pl.program_id(0) == pl.program_id(1))
        def _():
            rows = lax.broadcasted_iota(jnp.int32, (tm, tn), 0)
            cols = lax.broadcasted_iota(jnp.int32, (tm, tn), 1)
            o_ref[...] = k + jnp.where(rows == cols, noise_var, jnp.float32(0.0))


def _aat_kernel(a_ref, b_ref, o_ref, acc_ref):
    """Accumulating tiled matmul for K_X_inv = A @ A^T (A = U_inv).

    a_ref: A[i, k] tile (tm, tk);  b_ref: A[j, k] tile (tn, tk);
    result tile (i, j) = sum_k a @ b^T, accumulated in f32 VMEM scratch.
    """
    @pl.when(pl.program_id(2) == 0)
    def _():
        acc_ref[...] = jnp.zeros_like(acc_ref)

    acc_ref[...] += lax.dot_general(
        a_ref[...], b_ref[...],
        dimension_numbers=(((1,), (1,)), ((), ())),
        preferred_element_type=jnp.float32)

    o_ref[...] = acc_ref[...]


# ----------------------------------------------------------------------------- wrappers


def rbf_covariance(x1, x2, params, *, add_noise):
    """Tiled Pallas RBF covariance. `params` = f32[3] = [1/(2 l^2), s2, noise_var]."""
    n1, d = x1.shape
    n2 = x2.shape[0]
    tile = _choose_tile(max(n1, n2))
    n1p = _round_up(n1, tile)
    n2p = _round_up(n2, tile)

    x1p = _pad_rows(x1.astype(jnp.float32), n1p)             # (n1p, d)
    x2tp = _pad_rows(x2.astype(jnp.float32), n2p).T          # (d, n2p)

    kern = functools.partial(_rbf_cov_kernel,
                             add_noise=bool(add_noise),
                             use_mxu=d >= _MXU_MIN_D)

    out = pl.pallas_call(
        kern,
        out_shape=jax.ShapeDtypeStruct((n1p, n2p), jnp.float32),
        grid=(n1p // tile, n2p // tile),
        in_specs=[
            pl.BlockSpec(memory_space=pltpu.MemorySpace.SMEM),      # hyperparameters
            pl.BlockSpec((tile, d), lambda i, j: (i, 0)),           # X1 row block
            pl.BlockSpec((d, tile), lambda i, j: (0, j)),           # X2^T col block
        ],
        out_specs=pl.BlockSpec((tile, tile), lambda i, j: (i, j)),
        compiler_params=pltpu.CompilerParams(
            dimension_semantics=("parallel", "parallel"),
            vmem_limit_bytes=_VMEM_LIMIT_BYTES),
    )(params, x1p, x2tp)

    return out[:n1, :n2]


def a_at(a):
    """K_X_inv = A @ A^T via an accumulating tiled MXU matmul."""
    n = a.shape[0]
    tile = _choose_tile(n)
    n_pad = _round_up(n, tile)
    a_p = a.astype(jnp.float32)
    if n_pad != n:
        a_p = jnp.pad(a_p, ((0, n_pad - n), (0, n_pad - n)))
    nt = n_pad // tile

    # TODO(synk): exploit symmetry (compute only i<=j tiles and mirror) for another ~2x.
    out = pl.pallas_call(
        _aat_kernel,
        out_shape=jax.ShapeDtypeStruct((n_pad, n_pad), jnp.float32),
        grid_spec=pltpu.PrefetchScalarGridSpec(
            num_scalar_prefetch=0,
            grid=(nt, nt, nt),
            in_specs=[
                pl.BlockSpec((tile, tile), lambda i, j, k: (i, k)),
                pl.BlockSpec((tile, tile), lambda i, j, k: (j, k)),
            ],
            out_specs=pl.BlockSpec((tile, tile), lambda i, j, k: (i, j)),
            scratch_shapes=[pltpu.VMEM((tile, tile), jnp.float32)]),
        compiler_params=pltpu.CompilerParams(
            dimension_semantics=("parallel", "parallel", "arbitrary"),
            vmem_limit_bytes=_VMEM_LIMIT_BYTES),
    )(a_p, a_p)

    return out[:n, :n]


# ----------------------------------------------------------------------------- module


class GPPriorRBF:
    """JAX/Pallas port of GP_prior.forward with an RBF covariance and zero mean."""

    def __init__(self, active_dims, sigma_n_init=0.1, sigma_n_num=0.01,
                 lengthscale=1.0, outputscale=1.0):
        self.active_dims = None if active_dims is None else jnp.asarray(
            active_dims, dtype=jnp.int32)
        self.GP_with_noise = sigma_n_init is not None
        self.sigma_n_log = (jnp.float32(jnp.log(sigma_n_init))
                            if self.GP_with_noise else None)
        self.sigma_n_num = jnp.float32(sigma_n_num if sigma_n_num is not None else 0.0)
        self.lengthscale = float(lengthscale)
        self.outputscale = float(outputscale)

    def get_sigma_n_2(self):
        return jnp.exp(self.sigma_n_log) ** 2 + self.sigma_n_num ** 2

    def _active(self, X):
        if self.active_dims is None:
            return X
        return X[:, self.active_dims]

    def get_mean(self, X):
        # zero prior mean (get_mean is abstract in the superclass)
        return jnp.zeros((X.shape[0], 1), dtype=jnp.float32)

    def get_covariance(self, X1, X2=None, flg_noise=False):
        x1 = self._active(X1).astype(jnp.float32)
        self_cov = X2 is None
        x2 = x1 if self_cov else self._active(X2).astype(jnp.float32)
        # Noise only ever lands on the diagonal of a self-covariance.
        add_noise = bool(flg_noise and self.GP_with_noise and self_cov)
        noise_var = (self.get_sigma_n_2().astype(jnp.float32)
                     if add_noise else jnp.float32(0.0))
        # Hyperparameters go through SMEM -> no recompile when they change in training.
        params = jnp.stack([
            jnp.float32(0.5 / (self.lengthscale * self.lengthscale)),
            jnp.float32(self.outputscale),
            noise_var,
        ])
        return rbf_covariance(x1, x2, params, add_noise=add_noise)

    def forward(self, X):
        N = X.shape[0]
        if self.GP_with_noise:
            K_X = self.get_covariance(X, flg_noise=True)
        else:
            K_X = self.get_covariance(X)

        # TODO(synk): dense Cholesky / triangular inverse are sequential data-dependent
        # factorizations with no clean Pallas equivalent; done in XLA.
        L = jnp.linalg.cholesky(K_X)           # lower, L @ L.T = K
        U = L.T                                 # upper, U.T @ U = K (torch.cholesky(upper=True))

        # log-det needs only the N diagonal entries -> plain XLA (no N^2 EUP logs,
        # no extra kernel dispatch, no log() of off-diagonal zeros).
        log_det = 2.0 * jnp.sum(jnp.log(jnp.diagonal(U)))

        U_inv = jax.scipy.linalg.solve_triangular(U, jnp.eye(N, dtype=K_X.dtype),
                                                  lower=False)
        K_X_inv = a_at(U_inv)                   # Pallas tiled MXU matmul: U_inv @ U_inv.T
        m_X = self.get_mean(X)
        return m_X, K_X, K_X_inv, log_det

    __call__ = forward


# ----------------------------------------------------------------------------- main


def _reference_check(gp, X, active_dims, atol_k, atol_inv, atol_ld):
    m_X, K_X, K_X_inv, log_det = gp(X)
    jax.block_until_ready((m_X, K_X, K_X_inv, log_det))

    N = X.shape[0]
    Xa = X[:, jnp.asarray(active_dims)] if active_dims is not None else X
    sq = (jnp.sum(Xa * Xa, 1)[:, None] + jnp.sum(Xa * Xa, 1)[None, :]
          - 2.0 * Xa @ Xa.T)
    K_ref = jnp.exp(-0.5 * jnp.maximum(sq, 0.0)) + float(gp.get_sigma_n_2()) * jnp.eye(N)

    assert jnp.allclose(K_X, K_ref, atol=atol_k), "covariance mismatch"
    assert jnp.allclose(K_X_inv, jnp.linalg.inv(K_ref), atol=atol_inv), "inverse mismatch"
    assert jnp.allclose(log_det, jnp.linalg.slogdet(K_ref)[1], atol=atol_ld), "logdet mismatch"
    assert m_X.shape == (N, 1)


if __name__ == "__main__":
    key = jax.random.PRNGKey(0)

    # Small case (matches the module's typical usage): VPU direct-difference path,
    # single lane-dense 128x128 tile.
    N, D = 16, 6
    active_dims = [0, 1, 2, 3]
    X = jax.random.normal(key, (N, D), dtype=jnp.float32)
    gp = GPPriorRBF(active_dims=active_dims, sigma_n_init=0.1, sigma_n_num=0.01)
    _reference_check(gp, X, active_dims, atol_k=1e-4, atol_inv=1e-2, atol_ld=1e-3)

    # Larger case: exercises the 256-tiled grids, MXU Gram path, diagonal-tile noise
    # gating, k-looped A@A^T accumulation, and row padding.
    key2 = jax.random.PRNGKey(1)
    N2, D2 = 300, 40
    X2 = jax.random.normal(key2, (N2, D2), dtype=jnp.float32)
    gp2 = GPPriorRBF(active_dims=None, sigma_n_init=0.1, sigma_n_num=0.01)
    _reference_check(gp2, X2, None, atol_k=1e-4, atol_inv=1e-2, atol_ld=5e-3)

    print("KERNEL_OK")
</pallas_src>

<mosaic_0001>
module attributes {stable_mosaic.version = 11 : i64} {
  func.func @_rbf_cov_kernel(%arg0: i32, %arg1: i32, %arg2: memref<3xf32, #tpu.memory_space<smem>>, %arg3: memref<128x4xf32, #tpu.memory_space<vmem>>, %arg4: memref<4x128xf32, #tpu.memory_space<vmem>>, %arg5: memref<128x128xf32, #tpu.memory_space<vmem>>) attributes {dimension_semantics = [#tpu.dimension_semantics<parallel>, #tpu.dimension_semantics<parallel>], iteration_bounds = array<i64: 1, 1>, scalar_prefetch = 0 : i64, scratch_operands = 0 : i64, tpu.core_type = #tpu.core_type<tc>, window_params = [{transform_indices = @transform_0, window_bounds = array<i64: 3>}, {transform_indices = @transform_1, window_bounds = array<i64: 128, 4>}, {transform_indices = @transform_2, window_bounds = array<i64: 4, 128>}, {transform_indices = @transform_3, window_bounds = array<i64: 128, 128>}]} {
    %c0 = arith.constant 0 : index
    %0 = memref.load %arg2[%c0] : memref<3xf32, #tpu.memory_space<smem>>
    %c1 = arith.constant 1 : index
    %1 = memref.load %arg2[%c1] : memref<3xf32, #tpu.memory_space<smem>>
    %c0_0 = arith.constant 0 : index
    %c0_1 = arith.constant 0 : index
    %2 = vector.load %arg3[%c0_0, %c0_1] : memref<128x4xf32, #tpu.memory_space<vmem>>, vector<128x4xf32>
    %c0_2 = arith.constant 0 : index
    %c0_3 = arith.constant 0 : index
    %3 = vector.load %arg4[%c0_2, %c0_3] : memref<4x128xf32, #tpu.memory_space<vmem>>, vector<4x128xf32>
    %cst = arith.constant 0.000000e+00 : f32
    %4 = vector.broadcast %cst : f32 to vector<128x128xf32>
    %5 = vector.extract_strided_slice %2 {offsets = [0, 0], sizes = [128, 1], strides = [1, 1]} : vector<128x4xf32> to vector<128x1xf32>
    %6 = vector.extract_strided_slice %3 {offsets = [0, 0], sizes = [1, 128], strides = [1, 1]} : vector<4x128xf32> to vector<1x128xf32>
    %7 = vector.broadcast %5 : vector<128x1xf32> to vector<128x128xf32>
    %8 = vector.broadcast %6 : vector<1x128xf32> to vector<128x128xf32>
    %9 = arith.subf %7, %8 : vector<128x128xf32>
    %10 = arith.mulf %9, %9 : vector<128x128xf32>
    %11 = arith.addf %4, %10 : vector<128x128xf32>
    %12 = vector.extract_strided_slice %2 {offsets = [0, 1], sizes = [128, 1], strides = [1, 1]} : vector<128x4xf32> to vector<128x1xf32>
    %13 = vector.extract_strided_slice %3 {offsets = [1, 0], sizes = [1, 128], strides = [1, 1]} : vector<4x128xf32> to vector<1x128xf32>
    %14 = vector.broadcast %12 : vector<128x1xf32> to vector<128x128xf32>
    %15 = vector.broadcast %13 : vector<1x128xf32> to vector<128x128xf32>
    %16 = arith.subf %14, %15 : vector<128x128xf32>
    %17 = arith.mulf %16, %16 : vector<128x128xf32>
    %18 = arith.addf %11, %17 : vector<128x128xf32>
    %19 = vector.extract_strided_slice %2 {offsets = [0, 2], sizes = [128, 1], strides = [1, 1]} : vector<128x4xf32> to vector<128x1xf32>
    %20 = vector.extract_strided_slice %3 {offsets = [2, 0], sizes = [1, 128], strides = [1, 1]} : vector<4x128xf32> to vector<1x128xf32>
    %21 = vector.broadcast %19 : vector<128x1xf32> to vector<128x128xf32>
    %22 = vector.broadcast %20 : vector<1x128xf32> to vector<128x128xf32>
    %23 = arith.subf %21, %22 : vector<128x128xf32>
    %24 = arith.mulf %23, %23 : vector<128x128xf32>
    %25 = arith.addf %18, %24 : vector<128x128xf32>
    %26 = vector.extract_strided_slice %2 {offsets = [0, 3], sizes = [128, 1], strides = [1, 1]} : vector<128x4xf32> to vector<128x1xf32>
    %27 = vector.extract_strided_slice %3 {offsets = [3, 0], sizes = [1, 128], strides = [1, 1]} : vector<4x128xf32> to vector<1x128xf32>
    %28 = vector.broadcast %26 : vector<128x1xf32> to vector<128x128xf32>
    %29 = vector.broadcast %27 : vector<1x128xf32> to vector<128x128xf32>
    %30 = arith.subf %28, %29 : vector<128x128xf32>
    %31 = arith.mulf %30, %30 : vector<128x128xf32>
    %32 = arith.addf %25, %31 : vector<128x128xf32>
    %cst_4 = arith.constant 0.000000e+00 : f32
    %33 = vector.broadcast %cst_4 : f32 to vector<128x128xf32>
    %34 = arith.subf %33, %32 : vector<128x128xf32>
    %35 = vector.broadcast %0 : f32 to vector<128x128xf32>
    %36 = arith.mulf %34, %35 : vector<128x128xf32>
    %37 = math.exp %36 : vector<128x128xf32>
    %38 = vector.broadcast %1 : f32 to vector<128x128xf32>
    %39 = arith.mulf %38, %37 : vector<128x128xf32>
    %c0_5 = arith.constant 0 : index
    %c0_6 = arith.constant 0 : index
    %40 = vector.load %arg5[%c0_5, %c0_6] : memref<128x128xf32, #tpu.memory_space<vmem>>, vector<128x128xf32>
    tpu.vector_store %arg5[%c0_5, %c0_6], %39 {strides = array<i32>} : memref<128x128xf32, #tpu.memory_space<vmem>>, vector<128x128xf32>,
    %c2 = arith.constant 2 : index
    %41 = memref.load %arg2[%c2] : memref<3xf32, #tpu.memory_space<smem>>
    %42 = arith.cmpi eq, %arg0, %arg1 : i32
    %43 = arith.extui %42 : i1 to i32
    %c0_i32 = arith.constant 0 : i32
    %44 = arith.cmpi ne, %43, %c0_i32 : i32
    scf.if %44 {
      %45 = tpu.iota {dimensions = array<i32: 0>} : vector<128x128xi32>
      %46 = tpu.iota {dimensions = array<i32: 1>} : vector<128x128xi32>
      %47 = arith.cmpi eq, %45, %46 : vector<128x128xi32>
      %cst_7 = arith.constant 0.000000e+00 : f32
      %48 = vector.broadcast %41 : f32 to vector<128x128xf32>
      %49 = vector.broadcast %cst_7 : f32 to vector<128x128xf32>
      %50 = arith.select %47, %48, %49 : vector<128x128xi1>, vector<128x128xf32>
      %51 = arith.addf %39, %50 : vector<128x128xf32>
      %c0_8 = arith.constant 0 : index
      %c0_9 = arith.constant 0 : index
      %52 = vector.load %arg5[%c0_8, %c0_9] : memref<128x128xf32, #tpu.memory_space<vmem>>, vector<128x128xf32>
      tpu.vector_store %arg5[%c0_8, %c0_9], %51 {strides = array<i32>} : memref<128x128xf32, #tpu.memory_space<vmem>>, vector<128x128xf32>,
    } else {
    }
    return
  }
  func.func @transform_0(%arg0: i32, %arg1: i32) -> i32 {
    %c0_i32 = arith.constant 0 : i32
    %c0_i32_0 = arith.constant 0 : i32
    return %c0_i32 : i32
  }
  func.func @transform_1(%arg0: i32, %arg1: i32) -> (i32, i32) {
    %c0_i32 = arith.constant 0 : i32
    %c0_i32_0 = arith.constant 0 : i32
    return %arg0, %c0_i32 : i32, i32
  }
  func.func @transform_2(%arg0: i32, %arg1: i32) -> (i32, i32) {
    %c0_i32 = arith.constant 0 : i32
    %c0_i32_0 = arith.constant 0 : i32
    return %c0_i32, %arg1 : i32, i32
  }
  func.func @transform_3(%arg0: i32, %arg1: i32) -> (i32, i32) {
    %c0_i32 = arith.constant 0 : i32
    return %arg0, %arg1 : i32, i32
  }
}

</mosaic_0001>

<bundles_post_ra>
// kernel: tpu_custom_call.1
= control target key start
LH: loop header
LB: loop body
LE: loop exit
PB: predicated region body
PF: predicated region fallthrough
CT: control target
= control target key end

     0   :  { %8 = vsyncpa [#allocation4], 0  ;;  %s1333_s0 = inlined_call_operand.vmem [shape: f32[3], index: 0, kind: input, shape index: {}]   ;;  %s1334_s1 = inlined_call_operand.vmem [shape: f32[128,4], index: 1, kind: input, shape index: {}]   ;;  %s1335_s2 = inlined_call_operand.vmem [shape: f32[4,128], index: 2, kind: input, shape index: {}]   ;;  %s1336_s3 = inlined_call_operand.hbm [shape: f32[128,128], index: 3, kind: output, shape index: {}]  }
   0x1   :  { %9 = vsyncpa [#allocation3], 0  ;;  %s16_s14 = sshll.u32 %s1333_s0, 4  ;;  %s17_s14 = int_to_ptr.vmem [resolvable:$true] %s16_s14 }
   0x2   :  { %s781_s15 = scalar_lea.vmem %s17_s14, 16  ;;  %p786_p1 = scmp.lt.s32.totalorder %s17_s14, %s17_s14 }
   0x3   :  { %p782_p0 = scmp.ne.s32.totalorder %s17_s14, %s781_s15  ;;  %p787_p2 = scmp.lt.s32.totalorder %s781_s15, %s781_s15 }
   0x5   :  { %p788_p3 = por %p787_p2, %p786_p1 }
   0x7   :  { %p789_p4 = pnand %p788_p3, %p782_p0 }
   0x9   :  { %792 = shalt.err (!%p789_p4)
}
   0xa   :  { %s819_s16 = smov [#allocation2]  }
   0xb   :  { %19 = dma.vmem_to_smem %s17_s14, 16, %s819_s16, [#allocation4]  }
   0xc   :  { %815 = dma.done.wait [#allocation4], 16  }
   0xd   :  { %816 = vsyncadd [#allocation4], 4294967280 }
   0xe   :  { %27 = sfence }
   0xf   :  { %v853_v0 = vld [vmem:[%s1334_s1 + $0x10] sm:$0xff]  ;;  %v858_v1 = vld [vmem:[%s1334_s1] sm:$0xff]  ;;  %v820_v2 = vmov 0   ;;  %v865_v3 = vld [vmem:[%s1334_s1 + $0x18] sm:$0xff]  ;;  %v821_v17 = vmov 1   ;;  %v822_v18 = vmov 2   ;;  %v127_v30 = vlaneseq }
  0x10   :  { %742 = vset.pattern.permute.xlu1 %v820_v2  ;;  %741 = vset.pattern.permute.xlu0 %v820_v2  ;;  %v870_v4 = vld [vmem:[%s1334_s1 + $0x8] sm:$0xff]  ;;  %v882_v6 = vld [vmem:[%s1334_s1 + $0x20] sm:$0xff]  ;;  %v889_v7 = vld [vmem:[%s1334_s1 + $0x38] sm:$0xff]  ;;  %v823_v19 = vmov 3   ;;  %s28_s21 = sld [smem:[#allocation2]]  ;;  %s731_s22 = sld [smem:[#allocation2 + $0x1]] }
  0x11   :  { %59 = vperm.xlu1 %742, %v853_v0   ;;  %49 = vperm.xlu0 %741, %v858_v1   ;;  %v877_v5 = vld [vmem:[%s1334_s1 + $0x28] sm:$0xff]  ;;  %v894_v8 = vld [vmem:[%s1334_s1 + $0x30] sm:$0xff]  ;;  %v906_v10 = vld [vmem:[%s1334_s1 + $0x40] sm:$0xff]  ;;  %v977_v33 = vshrl.u32 %v127_v30, 7  ;;  %s824_s23 = smov [#allocation5]  }
  0x12   :  { %v901_v9 = vld [vmem:[%s1334_s1 + $0x48] sm:$0xff]  ;;  %v41_v11 = vld [vmem:[%s1334_s1 + $0x58] sm:$0xff]  ;;  %v916_v12 = vld [vmem:[%s1334_s1 + $0x50] sm:$0xff]  ;;  %s719_s24 = sshll.u32 %s824_s23, 4  ;;  %s720_s24 = int_to_ptr.vmem [resolvable:$true] %s719_s24 }
  0x13   :  { %v43_v13 = vld [vmem:[%s1334_s1 + $0x68] sm:$0xff]  ;;  %v42_v14 = vld [vmem:[%s1334_s1 + $0x60] sm:$0xff]  ;;  %v45_v15 = vld [vmem:[%s1334_s1 + $0x78] sm:$0xff]  ;;  %v129_v36 = vsub.s32 0, %v977_v33  ;;  %v245_v37 = vsub.s32 1, %v977_v33  ;;  %s793_s25 = scalar_lea.vmem %s720_s24, 2048  ;;  %p798_p6 = scmp.lt.s32.totalorder %s720_s24, %s720_s24 }
  0x14   :  { %v44_v16 = vld [vmem:[%s1334_s1 + $0x70] sm:$0xff]  ;;  %v986_v38 = vld [vmem:[%s1335_s2] sm:$0xf]  ;;  %s732_s2 = sld [smem:[#allocation2 + $0x2]]  ;;  %p794_p5 = scmp.ne.s32.totalorder %s720_s24, %s793_s25 }
  0x15   :  { %64 = vperm.xlu1 %742, %v865_v3   ;;  %54 = vperm.xlu0 %741, %v870_v4   ;;  %v991_v41 = vrot.slane %v986_v38, %v129_v36  ;;  %v994_v42 = vrot.slane %v986_v38, %v245_v37  ;;  %p799_p7 = scmp.lt.s32.totalorder %s793_s25, %s793_s25 }
  0x17   :  { %p800_p8 = por %p799_p7, %p798_p6 }
  0x19   :  { %74 = vperm.xlu1 %742, %v877_v5   ;;  %69 = vperm.xlu0 %741, %v882_v6   ;;  %p801_p9 = pnand %p800_p8, %p794_p5 }
  0x1d   :  { %84 = vperm.xlu1 %742, %v889_v7   ;;  %79 = vperm.xlu0 %741, %v894_v8  }
  0x21   :  { %94 = vperm.xlu1 %742, %v901_v9   ;;  %89 = vperm.xlu0 %741, %v906_v10  }
  0x25   :  { %104 = vperm.xlu1 %742, %v41_v11   ;;  %99 = vperm.xlu0 %741, %v916_v12  }
  0x29   :  { %114 = vperm.xlu1 %742, %v43_v13   ;;  %109 = vperm.xlu0 %741, %v42_v14  }
  0x2d   :  { %124 = vperm.xlu1 %742, %v45_v15   ;;  %119 = vperm.xlu0 %741, %v44_v16  }
  0x31   :  { %744 = vset.pattern.permute.xlu1 %v821_v17  ;;  %743 = vset.pattern.permute.xlu0 %v821_v17 }
  0x32   :  { %184 = vperm.xlu1 %744, %v870_v4   ;;  %180 = vperm.xlu0 %743, %v858_v1  }
  0x36   :  { %188 = vperm.xlu1 %744, %v853_v0   ;;  %192 = vperm.xlu0 %743, %v865_v3  }
  0x3a   :  { %196 = vperm.xlu1 %744, %v882_v6   ;;  %200 = vperm.xlu0 %743, %v877_v5  }
  0x3e   :  { %204 = vperm.xlu1 %744, %v894_v8   ;;  %208 = vperm.xlu0 %743, %v889_v7  }
  0x42   :  { %212 = vperm.xlu1 %744, %v906_v10   ;;  %216 = vperm.xlu0 %743, %v901_v9  }
  0x46   :  { %220 = vperm.xlu1 %744, %v916_v12   ;;  %224 = vperm.xlu0 %743, %v41_v11  }
  0x4a   :  { %228 = vperm.xlu1 %744, %v42_v14   ;;  %232 = vperm.xlu0 %743, %v43_v13  }
  0x4e   :  { %236 = vperm.xlu1 %744, %v44_v16   ;;  %240 = vperm.xlu0 %743, %v45_v15  }
  0x52   :  { %745 = vset.pattern.permute.xlu1 %v822_v18  ;;  %746 = vset.pattern.permute.xlu0 %v822_v18 }
  0x53   :  { %296 = vperm.xlu1 %745, %v858_v1   ;;  %300 = vperm.xlu0 %746, %v870_v4  }
  0x57   :  { %304 = vperm.xlu1 %745, %v853_v0   ;;  %312 = vperm.xlu0 %746, %v882_v6  }
  0x5b   :  { %308 = vperm.xlu1 %745, %v865_v3   ;;  %320 = vperm.xlu0 %746, %v894_v8  }
  0x5f   :  { %316 = vperm.xlu1 %745, %v877_v5   ;;  %328 = vperm.xlu0 %746, %v906_v10  }
  0x63   :  { %324 = vperm.xlu1 %745, %v889_v7   ;;  %336 = vperm.xlu0 %746, %v916_v12  }
  0x67   :  { %332 = vperm.xlu1 %745, %v901_v9   ;;  %344 = vperm.xlu0 %746, %v42_v14  }
  0x6b   :  { %340 = vperm.xlu1 %745, %v41_v11   ;;  %352 = vperm.xlu0 %746, %v44_v16  }
  0x6f   :  { %348 = vperm.xlu1 %745, %v43_v13   ;;  %747 = vset.pattern.permute.xlu0 %v823_v19 }
  0x70   :  { %412 = vperm.xlu0 %747, %v858_v1  }
  0x73   :  { %356 = vperm.xlu1 %745, %v45_v15  }
  0x74   :  { %424 = vperm.xlu0 %747, %v865_v3  }
  0x77   :  { %748 = vset.pattern.permute.xlu1 %v823_v19 }
  0x78   :  { %416 = vperm.xlu1 %748, %v870_v4   ;;  %432 = vperm.xlu0 %747, %v877_v5  }
  0x7c   :  { %420 = vperm.xlu1 %748, %v853_v0   ;;  %440 = vperm.xlu0 %747, %v889_v7  }
  0x80   :  { %428 = vperm.xlu1 %748, %v882_v6   ;;  %448 = vperm.xlu0 %747, %v901_v9  }
  0x84   :  { %436 = vperm.xlu1 %748, %v894_v8   ;;  %456 = vperm.xlu0 %747, %v41_v11  }
  0x88   :  { %444 = vperm.xlu1 %748, %v906_v10   ;;  %464 = vperm.xlu0 %747, %v43_v13  }
  0x8c   :  { %452 = vperm.xlu1 %748, %v916_v12   ;;  %472 = vperm.xlu0 %747, %v45_v15  }
  0x90   :  { %v60_v20 = vpop.permute.xlu1 %59  ;;  %460 = vperm.xlu1 %748, %v42_v14   ;;  %v964_v21 = vpop.permute.xlu0 %49 }
  0x91   :  { %v133_v47 = vsub.f32 %v60_v20, %v991_v41 }
  0x93   :  { %v149_v54 = vmul.f32 %v133_v47, %v133_v47 }
  0x94   :  { %v966_v22 = vpop.permute.xlu1 %64  ;;  %468 = vperm.xlu1 %748, %v44_v16   ;;  %v55_v23 = vpop.permute.xlu0 %54 }
  0x95   :  { %v132_v43 = vsub.f32 %v55_v23, %v991_v41 }
  0x97   :  { %v148_v48 = vmul.f32 %v132_v43, %v132_v43 }
  0x98   :  { %v968_v24 = vpop.permute.xlu1 %74  ;;  %v70_v25 = vpop.permute.xlu0 %69 }
  0x99   :  { %v135_v55 = vsub.f32 %v70_v25, %v991_v41 }
  0x9b   :  { %v151_v61 = vmul.f32 %v135_v55, %v135_v55 }
  0x9c   :  { %v970_v26 = vpop.permute.xlu1 %84  ;;  %v80_v27 = vpop.permute.xlu0 %79 }
  0x9d   :  { %v137_v62 = vsub.f32 %v80_v27, %v991_v41 }
  0x9f   :  { %v153_v4 = vmul.f32 %v137_v62, %v137_v62  ;;  %v632_v62 = vadd.s32 8, %v977_v33 }
  0xa0   :  { %v972_v28 = vpop.permute.xlu1 %94  ;;  %v90_v29 = vpop.permute.xlu0 %89 }
  0xa1   :  { %v139_v5 = vsub.f32 %v90_v29, %v991_v41 }
  0xa3   :  { %v155_v11 = vmul.f32 %v139_v5, %v139_v5  ;;  %v477_v5 = vsub.s32 3, %v977_v33 }
  0xa4   :  { %v974_v31 = vpop.permute.xlu1 %104  ;;  %v100_v32 = vpop.permute.xlu0 %99 }
  0xa5   :  { %v141_v12 = vsub.f32 %v100_v32, %v991_v41 }
  0xa7   :  { %v157_v18 = vmul.f32 %v141_v12, %v141_v12  ;;  %v134_v12 = vsub.f32 %v966_v22, %v991_v41  ;;  %v1100_v22 = vstv %s731_s22 }
  0xa8   :  { %v979_v34 = vpop.permute.xlu1 %114  ;;  %v110_v35 = vpop.permute.xlu0 %109 }
  0xa9   :  { %v143_v19 = vsub.f32 %v110_v35, %v991_v41 }
  0xab   :  { %v159_v32 = vmul.f32 %v143_v19, %v143_v19  ;;  %v1097_v19 = vstv %s28_s21 }
  0xac   :  { %v988_v39 = vpop.permute.xlu1 %124  ;;  %v120_v40 = vpop.permute.xlu0 %119 }
  0xad   :  { %v145_v36 = vsub.f32 %v120_v40, %v991_v41 }
  0xaf   :  { %v161_v35 = vmul.f32 %v145_v36, %v145_v36 }
  0xb1   :  { %v185_v44 = vpop.permute.xlu1 %184  ;;  %v997_v45 = vpop.permute.xlu0 %180 }
  0xb2   :  { %v248_v46 = vsub.f32 %v185_v44, %v994_v42 }
  0xb4   :  { %v264_v49 = vmul.f32 %v248_v46, %v248_v46 }
  0xb5   :  { %v189_v50 = vpop.permute.xlu1 %188  ;;  %v1001_v51 = vpop.permute.xlu0 %192 }
  0xb6   :  { %v1003_v52 = vadd.f32 %v264_v49, %v148_v48  ;;  %v249_v53 = vsub.f32 %v189_v50, %v994_v42 }
  0xb8   :  { %v265_v56 = vmul.f32 %v249_v53, %v249_v53 }
  0xb9   :  { %v197_v57 = vpop.permute.xlu1 %196  ;;  %v1007_v58 = vpop.permute.xlu0 %200 }
  0xba   :  { %v1009_v59 = vadd.f32 %v265_v56, %v149_v54  ;;  %v251_v60 = vsub.f32 %v197_v57, %v994_v42  ;;  %v1057_v57 = vand.u32 127, %v127_v30  ;;  %v638_v30 = vadd.s32 56, %v977_v33 }
  0xbc   :  { %v267_v63 = vmul.f32 %v251_v60, %v251_v60  ;;  %v361_v60 = vsub.s32 2, %v977_v33  ;;  %vm649_vm0 = vcmp.eq.s32.totalorder %v977_v33, %v1057_v57  ;;  %vm650_vm2 = vcmp.eq.s32.totalorder %v632_v62, %v1057_v57 }
  0xbd   :  { %v205_v0 = vpop.permute.xlu1 %204  ;;  %v1013_v1 = vpop.permute.xlu0 %208  ;;  %vm656_vm5 = vcmp.eq.s32.totalorder %v638_v30, %v1057_v57  ;;  %v142_v62 = vsub.f32 %v974_v31, %v991_v41 }
  0xbe   :  { %v1015_v2 = vadd.f32 %v267_v63, %v151_v61  ;;  %v253_v3 = vsub.f32 %v205_v0, %v994_v42  ;;  %v634_v61 = vadd.s32 24, %v977_v33  ;;  %v636_v63 = vadd.s32 40, %v977_v33 }
  0xbf   :  { %v633_v0 = vadd.s32 16, %v977_v33 }
  0xc0   :  { %v269_v6 = vmul.f32 %v253_v3, %v253_v3  ;;  %vm652_vm1 = vcmp.eq.s32.totalorder %v634_v61, %v1057_v57  ;;  %vm654_vm3 = vcmp.eq.s32.totalorder %v636_v63, %v1057_v57  ;;  %v144_v63 = vsub.f32 %v979_v34, %v991_v41 }
  0xc1   :  { %v213_v7 = vpop.permute.xlu1 %212  ;;  %v1019_v8 = vpop.permute.xlu0 %216  ;;  %vm651_vm4 = vcmp.eq.s32.totalorder %v633_v0, %v1057_v57  ;;  %v146_v0 = vsub.f32 %v988_v39, %v991_v41 }
  0xc2   :  { %v1021_v9 = vadd.f32 %v269_v6, %v153_v4  ;;  %v255_v10 = vsub.f32 %v213_v7, %v994_v42  ;;  %v1072_v6 = vstv %s732_s2  ;;  %v635_v7 = vadd.s32 32, %v977_v33 }
  0xc3   :  { %1339 = vst [vmem:[#allocation8_spill] sm:$0xff] %v1072_v6  ;;  %v1115_v36 = vsel %vm651_vm4, %v1072_v6, 0.0 }
  0xc4   :  { %v271_v13 = vmul.f32 %v255_v10, %v255_v10  ;;  %v131_v10 = vsub.f32 %v964_v21, %v991_v41  ;;  %v1092_v21 = vrot.slane %v986_v38, %v477_v5  ;;  %vm653_vm6 = vcmp.eq.s32.totalorder %v635_v7, %v1057_v57 }
  0xc5   :  { %v221_v14 = vpop.permute.xlu1 %220  ;;  %v1025_v15 = vpop.permute.xlu0 %224  ;;  %v256_v5 = vsub.f32 %v1019_v8, %v994_v42  ;;  %v1154_v7 = vadd.s32 48, %v977_v33 }
  0xc6   :  { %v1027_v16 = vadd.f32 %v271_v13, %v155_v11  ;;  %v257_v17 = vsub.f32 %v221_v14, %v994_v42  ;;  %v1078_v11 = vrot.slane %v986_v38, %v361_v60  ;;  %v640_v13 = vadd.s32 72, %v977_v33 }
  0xc7   :  { %v136_v38 = vsub.f32 %v968_v24, %v991_v41  ;;  %v140_v24 = vsub.f32 %v972_v28, %v991_v41  ;;  %v254_v28 = vsub.f32 %v1013_v1, %v994_v42  ;;  %v258_v34 = vsub.f32 %v1025_v15, %v994_v42 }
  0xc8   :  { %v273_v20 = vmul.f32 %v257_v17, %v257_v17  ;;  %vm658_vm7 = vcmp.eq.s32.totalorder %v640_v13, %v1057_v57  ;;  %v158_v13 = vmul.f32 %v142_v62, %v142_v62  ;;  %vm655_vm8 = vcmp.eq.s32.totalorder %v1154_v7, %v1057_v57 }
  0xc9   :  { %v229_v23 = vpop.permute.xlu1 %228  ;;  %v1031_v25 = vpop.permute.xlu0 %232  ;;  %v1149_v30 = vsel %vm658_vm7, %v1072_v6, 0.0  ;;  %v270_v15 = vmul.f32 %v254_v28, %v254_v28 }
  0xca   :  { %v1033_v27 = vadd.f32 %v273_v20, %v157_v18  ;;  %v259_v29 = vsub.f32 %v229_v23, %v994_v42  ;;  %v1095_v18 = vsel %vm649_vm0, %v1072_v6, 0.0  ;;  %v1103_v20 = vsel %vm652_vm1, %v1072_v6, 0.0  ;;  %1342 = vst [vmem:[#allocation11_spill] sm:$0xff] %v1149_v30 }
  0xcb   :  { %v1106_v23 = vsel %vm650_vm2, %v1072_v6, 0.0  ;;  %v272_v30 = vmul.f32 %v256_v5, %v256_v5 }
  0xcc   :  { %v275_v37 = vmul.f32 %v259_v29, %v259_v29  ;;  %v147_v29 = vmul.f32 %v131_v10, %v131_v10  ;;  %v156_v10 = vmul.f32 %v140_v24, %v140_v24 }
  0xcd   :  { %v237_v43 = vpop.permute.xlu1 %236  ;;  %v1037_v44 = vpop.permute.xlu0 %240 }
  0xce   :  { %v1039_v46 = vadd.f32 %v275_v37, %v159_v32  ;;  %v261_v47 = vsub.f32 %v237_v43, %v994_v42  ;;  %v1112_v32 = vsel %vm654_vm3, %v1072_v6, 0.0  ;;  %v150_v37 = vmul.f32 %v134_v12, %v134_v12 }
  0xcf   :  { %v247_v43 = vsub.f32 %v997_v45, %v994_v42  ;;  %v1134_v45 = vsel %vm653_vm6, %v1072_v6, 0.0 }
  0xd0   :  { %v277_v48 = vmul.f32 %v261_v47, %v261_v47  ;;  %v1120_v47 = vsel %vm656_vm5, %v1072_v6, 0.0  ;;  %1341 = vst [vmem:[#allocation10_spill] sm:$0xff] %v1134_v45  ;;  %v162_v6 = vmul.f32 %v146_v0, %v146_v0  ;;  %v260_v45 = vsub.f32 %v1031_v25, %v994_v42 }
  0xd1   :  { %1340 = vst [vmem:[#allocation9_spill] sm:$0xff] %v1120_v47  ;;  %v263_v31 = vmul.f32 %v247_v43, %v247_v43 }
  0xd2   :  { %v1042_v49 = vadd.f32 %v277_v48, %v161_v35  ;;  %v1044_v50 = vpop.permute.xlu1 %296  ;;  %v1046_v53 = vpop.permute.xlu0 %300  ;;  %v138_v35 = vsub.f32 %v970_v26, %v991_v41  ;;  %v250_v48 = vsub.f32 %v1001_v51, %v994_v42  ;;  %v252_v26 = vsub.f32 %v1007_v58, %v994_v42 }
  0xd3   :  { %v152_v51 = vmul.f32 %v136_v38, %v136_v38  ;;  %v1157_v58 = vadd.s32 88, %v977_v33  ;;  %v363_v39 = vsub.f32 %v1044_v50, %v1078_v11  ;;  %v160_v38 = vmul.f32 %v144_v63, %v144_v63 }
  0xd4   :  { %v154_v1 = vmul.f32 %v138_v35, %v138_v35  ;;  %v266_v12 = vmul.f32 %v250_v48, %v250_v48  ;;  %v268_v43 = vmul.f32 %v252_v26, %v252_v26  ;;  %v262_v35 = vsub.f32 %v1037_v44, %v994_v42 }
  0xd5   :  { %v279_v24 = vadd.f32 %v263_v31, %v147_v29  ;;  %v274_v48 = vmul.f32 %v258_v34, %v258_v34  ;;  %v364_v50 = vsub.f32 %v1046_v53, %v1078_v11  ;;  %v379_v63 = vmul.f32 %v363_v39, %v363_v39 }
  0xd6   :  { %v1048_v54 = vpop.permute.xlu1 %304  ;;  %v1050_v55 = vpop.permute.xlu0 %312  ;;  %v282_v62 = vadd.f32 %v266_v12, %v150_v37  ;;  %v284_v0 = vadd.f32 %v268_v43, %v152_v51  ;;  %v286_v5 = vadd.f32 %v270_v15, %v154_v1  ;;  %v288_v29 = vadd.f32 %v272_v30, %v156_v10 }
  0xd7   :  { %v365_v47 = vsub.f32 %v1048_v54, %v1078_v11  ;;  %v367_v26 = vsub.f32 %v1050_v55, %v1078_v11  ;;  %v276_v54 = vmul.f32 %v260_v45, %v260_v45  ;;  %v278_v37 = vmul.f32 %v262_v35, %v262_v35 }
  0xd8   :  { %v1182_v34 = vadd.f32 %v274_v48, %v158_v13  ;;  %v380_v55 = vmul.f32 %v364_v50, %v364_v50  ;;  %v395_v51 = vadd.f32 %v379_v63, %v279_v24  ;;  %vm660_vm9 = vcmp.eq.s32.totalorder %v1157_v58, %v1057_v57 }
  0xd9   :  { %v381_v12 = vmul.f32 %v365_v47, %v365_v47  ;;  %v383_v1 = vmul.f32 %v367_v26, %v367_v26  ;;  %v1192_v13 = vadd.f32 %v276_v54, %v160_v38  ;;  %v1194_v47 = vadd.f32 %v278_v37, %v162_v6 }
  0xda   :  { %v1052_v40 = vpop.permute.xlu1 %308  ;;  %v1054_v56 = vpop.permute.xlu0 %320  ;;  %v396_v24 = vadd.f32 %v380_v55, %v1003_v52  ;;  %v646_v58 = vadd.s32 120, %v977_v33 }
  0xdb   :  { %v366_v28 = vsub.f32 %v1052_v40, %v1078_v11  ;;  %v369_v42 = vsub.f32 %v1054_v56, %v1078_v11  ;;  %v397_v48 = vadd.f32 %v381_v12, %v1009_v59 }
  0xdc   :  { %vm664_vm13 = vcmp.eq.s32.totalorder %v646_v58, %v1057_v57 }
  0xdd   :  { %v382_v39 = vmul.f32 %v366_v28, %v366_v28 }
  0xde   :  { %v1064_v3 = vpop.permute.xlu1 %316  ;;  %v1066_v4 = vpop.permute.xlu0 %328 }
  0xdf   :  { %v368_v44 = vsub.f32 %v1064_v3, %v1078_v11  ;;  %v371_v40 = vsub.f32 %v1066_v4, %v1078_v11  ;;  %v385_v3 = vmul.f32 %v369_v42, %v369_v42 }
  0xe1   :  { %v384_v15 = vmul.f32 %v368_v44, %v368_v44  ;;  %v387_v50 = vmul.f32 %v371_v40, %v371_v40  ;;  %v1205_v6 = vadd.f32 %v385_v3, %v1021_v9 }
  0xe2   :  { %v1087_v14 = vpop.permute.xlu1 %324  ;;  %v1089_v17 = vpop.permute.xlu0 %336 }
  0xe3   :  { %v370_v45 = vsub.f32 %v1087_v14, %v1078_v11  ;;  %v373_v30 = vsub.f32 %v1089_v17, %v1078_v11  ;;  %v1202_v14 = vadd.f32 %v383_v1, %v1015_v2  ;;  %v398_v17 = vadd.f32 %v382_v39, %v282_v62 }
  0xe4   :  { %v400_v28 = vadd.f32 %v384_v15, %v284_v0  ;;  %v1211_v2 = vadd.f32 %v387_v50, %v1027_v16 }
  0xe5   :  { %v386_v42 = vmul.f32 %v370_v45, %v370_v45  ;;  %v389_v44 = vmul.f32 %v373_v30, %v373_v30 }
  0xe6   :  { %v1129_v60 = vpop.permute.xlu1 %332  ;;  %v1131_v61 = vpop.permute.xlu0 %344 }
  0xe7   :  { %v372_v63 = vsub.f32 %v1129_v60, %v1078_v11  ;;  %v375_v9 = vsub.f32 %v1131_v61, %v1078_v11  ;;  %v1218_v1 = vadd.f32 %v389_v44, %v1033_v27 }
  0xe9   :  { %v388_v62 = vmul.f32 %v372_v63, %v372_v63  ;;  %v1224_v45 = vmul.f32 %v375_v9, %v375_v9 }
  0xea   :  { %v1161_v41 = vpop.permute.xlu1 %340  ;;  %v1163_v8 = vpop.permute.xlu0 %352 }
  0xeb   :  { %v374_v0 = vsub.f32 %v1161_v41, %v1078_v11  ;;  %v377_v39 = vsub.f32 %v1163_v8, %v1078_v11 }
  0xed   :  { %v390_v30 = vmul.f32 %v374_v0, %v374_v0  ;;  %v1228_v50 = vmul.f32 %v377_v39, %v377_v39 }
  0xee   :  { %v349_v25 = vpop.permute.xlu1 %348 }
  0xef   :  { %v413_v53 = vpop.permute.xlu0 %412  ;;  %v376_v16 = vsub.f32 %v349_v25, %v1078_v11  ;;  %v406_v44 = vadd.f32 %v390_v30, %v1182_v34 }
  0xf0   :  { %v479_v31 = vsub.f32 %v413_v53, %v1092_v21 }
  0xf1   :  { %v392_v25 = vmul.f32 %v376_v16, %v376_v16 }
  0xf2   :  { %v495_v56 = vmul.f32 %v479_v31, %v479_v31  ;;  %v1186_v43 = vpop.permute.xlu1 %356 }
  0xf3   :  { %v425_v10 = vpop.permute.xlu0 %424 }
  0xf4   :  { %v511_v4 = vadd.f32 %v495_v56, %v395_v51  ;;  %v482_v35 = vsub.f32 %v425_v10, %v1092_v21  ;;  %v402_v51 = vadd.f32 %v386_v42, %v286_v5  ;;  %v404_v10 = vadd.f32 %v388_v62, %v288_v29 }
  0xf5   :  { %v408_v62 = vadd.f32 %v392_v25, %v1192_v13 }
  0xf6   :  { %v527_v26 = vsub.f32 0.0, %v511_v4  ;;  %v498_v38 = vmul.f32 %v482_v35, %v482_v35 }
  0xf7   :  { %v417_v53 = vpop.permute.xlu1 %416  ;;  %v433_v52 = vpop.permute.xlu0 %432 }
  0xf8   :  { %v544_v59 = vmul.f32 %v1097_v19, %v527_v26  ;;  %v514_v54 = vadd.f32 %v498_v38, %v398_v17  ;;  %v480_v37 = vsub.f32 %v417_v53, %v1092_v21  ;;  %v484_v60 = vsub.f32 %v433_v52, %v1092_v21 }
  0xfa   :  { %v560_v31 = vmul.f32 1.442695, %v544_v59  ;;  %v530_v55 = vsub.f32 0.0, %v514_v54  ;;  %v496_v12 = vmul.f32 %v480_v37, %v480_v37  ;;  %v500_v40 = vmul.f32 %v484_v60, %v484_v60 }
  0xfb   :  { %v421_v56 = vpop.permute.xlu1 %420  ;;  %v441_v3 = vpop.permute.xlu0 %440  ;;  %v378_v59 = vsub.f32 %v1186_v43, %v1078_v11 }
  0xfc   :  { %749 = vpow2.f32 %v560_v31  ;;  %v547_v61 = vmul.f32 %v1097_v19, %v530_v55  ;;  %v512_v15 = vadd.f32 %v496_v12, %v396_v24  ;;  %v516_v41 = vadd.f32 %v500_v40, %v400_v28 }
  0xfd   :  { %v481_v5 = vsub.f32 %v421_v56, %v1092_v21  ;;  %v486_v27 = vsub.f32 %v441_v3, %v1092_v21  ;;  %v394_v13 = vmul.f32 %v378_v59, %v378_v59 }
  0xfe   :  { %v566_v4 = vmul.f32 1.442695, %v547_v61  ;;  %v528_v35 = vsub.f32 0.0, %v512_v15  ;;  %v532_v8 = vsub.f32 0.0, %v516_v41 }
  0xff   :  { %v497_v63 = vmul.f32 %v481_v5, %v481_v5  ;;  %v502_v17 = vmul.f32 %v486_v27, %v486_v27  ;;  %v429_v26 = vpop.permute.xlu1 %428  ;;  %v449_v38 = vpop.permute.xlu0 %448 }
 0x100   :  { %751 = vpow2.f32 %v566_v4  ;;  %v545_v24 = vmul.f32 %v1097_v19, %v528_v35  ;;  %v549_v28 = vmul.f32 %v1097_v19, %v532_v8  ;;  %v483_v42 = vsub.f32 %v429_v26, %v1092_v21 }
 0x101   :  { %v513_v29 = vadd.f32 %v497_v63, %v397_v48  ;;  %v518_v53 = vadd.f32 %v502_v17, %v402_v51  ;;  %v488_v52 = vsub.f32 %v449_v38, %v1092_v21 }
 0x102   :  { %v562_v54 = vmul.f32 1.442695, %v545_v24  ;;  %v570_v37 = vmul.f32 1.442695, %v549_v28  ;;  %v499_v60 = vmul.f32 %v483_v42, %v483_v42 }
 0x103   :  { %v529_v9 = vsub.f32 0.0, %v513_v29  ;;  %v534_v0 = vsub.f32 0.0, %v518_v53  ;;  %v504_v31 = vmul.f32 %v488_v52, %v488_v52  ;;  %v437_v55 = vpop.permute.xlu1 %436  ;;  %v457_v12 = vpop.permute.xlu0 %456 }
 0x104   :  { %753 = vpow2.f32 %v562_v54  ;;  %v515_v34 = vadd.f32 %v499_v60, %v1202_v14  ;;  %v485_v48 = vsub.f32 %v437_v55, %v1092_v21  ;;  %v490_v40 = vsub.f32 %v457_v12, %v1092_v21 }
 0x105   :  { %755 = vpow2.f32 %v570_v37  ;;  %v546_v11 = vmul.f32 %v1097_v19, %v529_v9  ;;  %v551_v43 = vmul.f32 %v1097_v19, %v534_v0  ;;  %v520_v51 = vadd.f32 %v504_v31, %v404_v10 }
 0x106   :  { %v750_v39 = vpop.eup %749  ;;  %v531_v16 = vsub.f32 0.0, %v515_v34  ;;  %v501_v56 = vmul.f32 %v485_v48, %v485_v48  ;;  %v506_v3 = vmul.f32 %v490_v40, %v490_v40  ;;  %v410_v48 = vadd.f32 %v394_v13, %v1194_v47 }
 0x107   :  { %v593_v61 = vmul.f32 %v750_v39, %v1100_v22  ;;  %v564_v15 = vmul.f32 1.442695, %v546_v11  ;;  %v574_v41 = vmul.f32 1.442695, %v551_v43  ;;  %v536_v14 = vsub.f32 0.0, %v520_v51  ;;  %v445_v30 = vpop.permute.xlu1 %444  ;;  %v465_v5 = vpop.permute.xlu0 %464 }
 0x108   :  { %v548_v27 = vmul.f32 %v1097_v19, %v531_v16  ;;  %v517_v4 = vadd.f32 %v501_v56, %v1205_v6  ;;  %v522_v35 = vadd.f32 %v506_v3, %v406_v44  ;;  %v487_v8 = vsub.f32 %v445_v30, %v1092_v21 }
 0x109   :  { %v682_v10 = vadd.f32 %v1095_v18, %v593_v61  ;;  %757 = vpow2.f32 %v564_v15  ;;  %v553_v25 = vmul.f32 %v1097_v19, %v536_v14  ;;  %v492_v63 = vsub.f32 %v465_v5, %v1092_v21 }
 0x10a   :  { %v752_v17 = vpop.eup %751  ;;  %759 = vpow2.f32 %v574_v41  ;;  %v568_v26 = vmul.f32 1.442695, %v548_v27  ;;  %v533_v38 = vsub.f32 0.0, %v517_v4  ;;  %v538_v24 = vsub.f32 0.0, %v522_v35 }
 0x10b   :  { %698 = vst [vmem:[#allocation5] sm:$0xff] %v682_v10  ;;  %v596_v28 = vmul.f32 %v752_v17, %v1100_v22  ;;  %v578_v42 = vmul.f32 1.442695, %v553_v25  ;;  %v503_v6 = vmul.f32 %v487_v8, %v487_v8  ;;  %v508_v44 = vmul.f32 %v492_v63, %v492_v63  ;;  %v453_v29 = vpop.permute.xlu1 %452  ;;  %v473_v53 = vpop.permute.xlu0 %472 }
 0x10c   :  { %761 = vpow2.f32 %v568_v26  ;;  %v550_v18 = vmul.f32 %v1097_v19, %v533_v38  ;;  %v555_v52 = vmul.f32 %v1097_v19, %v538_v24  ;;  %v489_v59 = vsub.f32 %v453_v29, %v1092_v21  ;;  %v1343_v38 = vld [vmem:[#allocation9_spill] sm:$0xff] }
 0x10d   :  { %v685_v54 = vadd.f32 %v1103_v20, %v596_v28  ;;  %763 = vpow2.f32 %v578_v42  ;;  %v519_v37 = vadd.f32 %v503_v6, %v1211_v2  ;;  %v524_v60 = vadd.f32 %v508_v44, %v408_v62 }
 0x10e   :  { %v754_v9 = vpop.eup %753  ;;  %v572_v0 = vmul.f32 1.442695, %v550_v18  ;;  %v582_v31 = vmul.f32 1.442695, %v555_v52  ;;  %v505_v55 = vmul.f32 %v489_v59, %v489_v59  ;;  %v494_v12 = vsub.f32 %v473_v53, %v1092_v21  ;;  %v1345_v52 = vld [vmem:[#allocation11_spill] sm:$0xff] }
 0x10f   :  { %v756_v34 = vpop.eup %755  ;;  %701 = vst [vmem:[#allocation5 + $0x18] sm:$0xff] %v685_v54  ;;  %v594_v40 = vmul.f32 %v754_v9, %v1100_v22  ;;  %v535_v20 = vsub.f32 0.0, %v519_v37  ;;  %v540_v2 = vsub.f32 0.0, %v524_v60  ;;  %v461_v62 = vpop.permute.xlu1 %460  ;;  %v407_v41 = vadd.f32 %v1224_v45, %v1039_v46  ;;  %v1346_v54 = vld [vmem:[#allocation8_spill] sm:$0xff] }
 0x110   :  { %v598_v11 = vmul.f32 %v756_v34, %v1100_v22  ;;  %765 = vpow2.f32 %v572_v0  ;;  %v521_v43 = vadd.f32 %v505_v55, %v1218_v1  ;;  %v510_v51 = vmul.f32 %v494_v12, %v494_v12 }
 0x111   :  { %v683_v47 = vadd.f32 %v1106_v23, %v594_v40  ;;  %767 = vpow2.f32 %v582_v31  ;;  %v552_v39 = vmul.f32 %v1097_v19, %v535_v20  ;;  %v557_v13 = vmul.f32 %v1097_v19, %v540_v2 }
 0x112   :  { %v687_v16 = vadd.f32 %v1112_v32, %v598_v11  ;;  %v537_v56 = vsub.f32 0.0, %v521_v43  ;;  %v526_v3 = vadd.f32 %v510_v51, %v410_v48  ;;  %v491_v61 = vsub.f32 %v461_v62, %v1092_v21 }
 0x113   :  { %v758_v15 = vpop.eup %757  ;;  %699 = vst [vmem:[#allocation5 + $0x8] sm:$0xff] %v683_v47  ;;  %v639_v1 = vadd.s32 64, %v977_v33  ;;  %v576_v14 = vmul.f32 1.442695, %v552_v39  ;;  %v586_v23 = vmul.f32 1.442695, %v557_v13  ;;  %v469_v30 = vpop.permute.xlu1 %468  ;;  %v409_v8 = vadd.f32 %v1228_v50, %v1042_v49 }
 0x114   :  { %v760_v5 = vpop.eup %759  ;;  %703 = vst [vmem:[#allocation5 + $0x28] sm:$0xff] %v687_v16  ;;  %v595_v27 = vmul.f32 %v758_v15, %v1100_v22  ;;  %v554_v32 = vmul.f32 %v1097_v19, %v537_v56  ;;  %v542_v4 = vsub.f32 0.0, %v526_v3  ;;  %v507_v35 = vmul.f32 %v491_v61, %v491_v61 }
 0x115   :  { %v600_v10 = vmul.f32 %v760_v5, %v1100_v22  ;;  %769 = vpow2.f32 %v576_v14  ;;  %v493_v46 = vsub.f32 %v469_v30, %v1092_v21  ;;  %v644_v50 = vadd.s32 104, %v977_v33 }
 0x116   :  { %v762_v45 = vpop.eup %761  ;;  %v684_v25 = vadd.f32 %v1115_v36, %v595_v27  ;;  %771 = vpow2.f32 %v586_v23  ;;  %v580_v63 = vmul.f32 1.442695, %v554_v32  ;;  %v559_v17 = vmul.f32 %v1097_v19, %v542_v4  ;;  %v1344_v36 = vld [vmem:[#allocation10_spill] sm:$0xff] }
 0x117   :  { %v764_v26 = vpop.eup %763  ;;  %v689_v24 = vadd.f32 %v1343_v38, %v600_v10  ;;  %v597_v28 = vmul.f32 %v762_v45, %v1100_v22  ;;  %v523_v42 = vadd.f32 %v507_v35, %v407_v41  ;;  %v509_v6 = vmul.f32 %v493_v46, %v493_v46 }
 0x118   :  { %700 = vst [vmem:[#allocation5 + $0x10] sm:$0xff] %v684_v25  ;;  %v602_v49 = vmul.f32 %v764_v26, %v1100_v22  ;;  %773 = vpow2.f32 %v580_v63  ;;  %v590_v21 = vmul.f32 1.442695, %v559_v17  ;;  %v672_v37 = vsel %vm655_vm8, %v1346_v54, 0.0 }
 0x119   :  { %705 = vst [vmem:[#allocation5 + $0x38] sm:$0xff] %v689_v24  ;;  %v686_v44 = vadd.f32 %v1344_v36, %v597_v28  ;;  %v539_v29 = vsub.f32 0.0, %v523_v42  ;;  %v525_v53 = vadd.f32 %v509_v6, %v409_v8  ;;  %v677_v60 = vsel %vm660_vm9, %v1346_v54, 0.0 }
 0x11a   :  { %v766_v18 = vpop.eup %765  ;;  %v691_v59 = vadd.f32 %v1345_v52, %v602_v49  ;;  %775 = vpow2.f32 %v590_v21  ;;  %v641_v31 = vadd.s32 80, %v977_v33  ;;  %vm657_vm10 = vcmp.eq.s32.totalorder %v639_v1, %v1057_v57 }
 0x11b   :  { %v768_v9 = vpop.eup %767  ;;  %702 = vst [vmem:[#allocation5 + $0x20] sm:$0xff] %v686_v44  ;;  %v599_v0 = vmul.f32 %v766_v18, %v1100_v22  ;;  %v556_v55 = vmul.f32 %v1097_v19, %v539_v29  ;;  %v541_v12 = vsub.f32 0.0, %v525_v53  ;;  %vm662_vm11 = vcmp.eq.s32.totalorder %v644_v50, %v1057_v57 }
 0x11c   :  { %707 = vst [vmem:[#allocation5 + $0x48] sm:$0xff] %v691_v59  ;;  %v604_v34 = vmul.f32 %v768_v9, %v1100_v22  ;;  %v674_v62 = vsel %vm657_vm10, %v1346_v54, 0.0  ;;  %vm659_vm12 = vcmp.eq.s32.totalorder %v641_v31, %v1057_v57  ;;  %v679_v47 = vsel %vm662_vm11, %v1346_v54, 0.0 }
 0x11d   :  { %v688_v7 = vadd.f32 %v672_v37, %v599_v0  ;;  %v584_v48 = vmul.f32 1.442695, %v556_v55  ;;  %v558_v40 = vmul.f32 %v1097_v19, %v541_v12  ;;  %v676_v16 = vsel %vm659_vm12, %v1346_v54, 0.0 }
 0x11e   :  { %v693_v20 = vadd.f32 %v677_v60, %v604_v34  ;;  %v643_v56 = vadd.s32 96, %v977_v33  ;;  %v681_v41 = vsel %vm664_vm13, %v1346_v54, 0.0  ;;  %v645_v1 = vadd.s32 112, %v977_v33 }
 0x11f   :  { %v770_v2 = vpop.eup %769  ;;  %704 = vst [vmem:[#allocation5 + $0x30] sm:$0xff] %v688_v7  ;;  %777 = vpow2.f32 %v584_v48  ;;  %v588_v11 = vmul.f32 1.442695, %v558_v40 }
 0x120   :  { %v772_v43 = vpop.eup %771  ;;  %709 = vst [vmem:[#allocation5 + $0x58] sm:$0xff] %v693_v20  ;;  %v601_v51 = vmul.f32 %v770_v2, %v1100_v22  ;;  %vm661_vm14 = vcmp.eq.s32.totalorder %v643_v56, %v1057_v57  ;;  %vm663_vm15 = vcmp.eq.s32.totalorder %v645_v1, %v1057_v57 }
 0x121   :  { %v606_v39 = vmul.f32 %v772_v43, %v1100_v22  ;;  %779 = vpow2.f32 %v588_v11  ;;  %v678_v27 = vsel %vm661_vm14, %v1346_v54, 0.0  ;;  %v680_v35 = vsel %vm663_vm15, %v1346_v54, 0.0 }
 0x122   :  { %v774_v19 = vpop.eup %773  ;;  %v690_v13 = vadd.f32 %v674_v62, %v601_v51 }
 0x123   :  { %v695_v3 = vadd.f32 %v679_v47, %v606_v39  ;;  %v603_v61 = vmul.f32 %v774_v19, %v1100_v22 }
 0x124   :  { %v776_v15 = vpop.eup %775  ;;  %706 = vst [vmem:[#allocation5 + $0x40] sm:$0xff] %v690_v13 }
 0x125   :  { %711 = vst [vmem:[#allocation5 + $0x68] sm:$0xff] %v695_v3  ;;  %v692_v14 = vadd.f32 %v676_v16, %v603_v61  ;;  %v608_v23 = vmul.f32 %v776_v15, %v1100_v22 }
 0x127   :  { %708 = vst [vmem:[#allocation5 + $0x50] sm:$0xff] %v692_v14  ;;  %v697_v30 = vadd.f32 %v681_v41, %v608_v23 }
 0x129   :  { %v778_v5 = vpop.eup %777  ;;  %713 = vst [vmem:[#allocation5 + $0x78] sm:$0xff] %v697_v30 }
 0x12a   :  { %v605_v32 = vmul.f32 %v778_v5, %v1100_v22 }
 0x12b   :  { %v780_v4 = vpop.eup %779 }
 0x12c   :  { %v694_v33 = vadd.f32 %v678_v27, %v605_v32  ;;  %v607_v8 = vmul.f32 %v780_v4, %v1100_v22 }
 0x12e   :  { %710 = vst [vmem:[#allocation5 + $0x60] sm:$0xff] %v694_v33  ;;  %v696_v10 = vadd.f32 %v680_v35, %v607_v8 }
 0x130   :  { %712 = vst [vmem:[#allocation5 + $0x70] sm:$0xff] %v696_v10 }
 0x131   :  { %804 = shalt.err (!%p801_p9)
}
 0x132   :  { %s805_s28 = scalar_lea.hbm %s1336_s3, 2048 }
 0x133   :  { %p806_p10 = scmp.ne.s32.totalorder %s1336_s3, %s805_s28  ;;  %p809_p11 = scmp.lt.u32.totalorder %s805_s28, %s1336_s3 }
 0x135   :  { %p811_p12 = pnand %p809_p11, %p806_p10 }
 0x137   :  { %814 = shalt.err (!%p811_p12)
}
 0x138   :  { %s825_s6 = smov 128   ;;  %s826_s7 = smov 8  }
 0x139   :  { %725 = dma.vmem_to_hbm [thread:$0]  %s720_s24, 2048, %s1336_s3, [#allocation3], %s825_s6, %s825_s6, %s826_s7  }
 0x13a   :  { %817 = dma.done.wait [#allocation3], 2048  }
 0x13b   :  { %818 = vsyncadd [#allocation3], 4294965248 }
 0x13c   :  { %729 = vsyncpa [#allocation3], 1 }
 0x13d   :  { %730 = vsyncpa [#allocation4], 1 }

</bundles_post_ra>
